<compile_context>
chip_gen: v5e
topology: v5e:2x2
jax: 0.10.0
libtpu: 0.0.40
codegen_flags: <defaults>
</compile_context>

<pallas_src>
import functools

import jax
import jax.numpy as jnp
from jax.experimental import pallas as pl
from jax.experimental.pallas import tpu as pltpu


def _round_up(x, m):
    return ((x + m - 1) // m) * m


def _cdiv(a, b):
    return (a + b - 1) // b


@functools.lru_cache(maxsize=1)
def _vmem_limit_bytes():
    """Scoped-VMEM limit with headroom for compiler internal scratch / double-buffers."""
    try:
        cap = pltpu.get_tpu_info().vmem_capacity_bytes
        # v5e/v6e (128 MiB) -> ~109 MiB; v7x (64 MiB) -> ~54 MiB.
        return max(32 * 1024 * 1024, min(cap - 8 * 1024 * 1024, int(cap * 0.85)))
    except Exception:
        return 48 * 1024 * 1024  # conservative fallback: safe on every generation


def sae_kernel(x_ref, w_enc_ref, b_enc_ref, w_dec_ref, b_dec_ref,
               enc_ref, dec_ref, *scratch):
    h = pl.program_id(1)

    # Decoder accumulator: the f32 `decoded` output block itself (resident across the
    # hidden sweep, block index (b, 0) constant over h) or an f32 VMEM scratch when the
    # output dtype is narrower than f32.
    acc_ref = scratch[0] if scratch else dec_ref

    # Initialize with the decoder bias so it is applied exactly once per batch tile.
    @pl.when(h == 0)
    def _():
        acc_ref[...] = jnp.broadcast_to(
            b_dec_ref[...].astype(jnp.float32), acc_ref.shape)

    # Encoder: relu(x @ W_e[:, h_tile] + b_e[h_tile]).
    # bf16 operands on the MXU, f32 accumulation + f32 bias/ReLU epilogue.
    pre = jnp.dot(x_ref[...].astype(jnp.bfloat16),
                  w_enc_ref[...].astype(jnp.bfloat16),
                  preferred_element_type=jnp.float32)
    encoded = jnp.maximum(pre + b_enc_ref[...].astype(jnp.float32), 0.0)
    enc_ref[...] = encoded.astype(enc_ref.dtype)

    # Decoder partial: acc += encoded_tile @ W_d[h_tile, :]  (bf16 MXU, f32 accumulate).
    acc_ref[...] += jnp.dot(encoded.astype(jnp.bfloat16),
                            w_dec_ref[...].astype(jnp.bfloat16),
                            preferred_element_type=jnp.float32)

    if scratch:
        # Narrow output dtype: cast the f32 accumulator to the output once, at the end.
        @pl.when(h == pl.num_programs(1) - 1)
        def _():
            dec_ref[...] = acc_ref[...].astype(dec_ref.dtype)


@functools.partial(jax.jit, static_argnames=("tb", "th"))
def simple_sae_forward(x, w_enc, b_enc, w_dec, b_dec, *, tb=512, th=512):
    """Pallas forward pass. Returns (encoded, decoded) like SimpleSAE.forward.

    x:     (B, input_dim)
    w_enc: (input_dim, hidden_dim)   == torch encoder.weight.T
    b_enc: (1, hidden_dim)
    w_dec: (hidden_dim, input_dim)   == torch decoder.weight.T
    b_dec: (1, input_dim)
    """
    B, D_in = x.shape
    D_hid = w_enc.shape[1]
    dtype = x.dtype
    out_is_f32 = jnp.dtype(dtype) == jnp.dtype(jnp.float32)

    # ---- minimal (8,128)-aligned padded extents -----------------------------------
    D_in_p = _round_up(D_in, 128)
    D_hid_p128 = _round_up(D_hid, 128)
    B_p8 = _round_up(B, 8)

    # ---- tile selection: shrink TH (weight-slab size) before TB (weight reuse) ----
    x_bytes = jnp.dtype(dtype).itemsize
    out_bytes = x_bytes
    w_bytes = 2  # weights streamed as bf16

    vmem_limit = _vmem_limit_bytes()
    budget = int(vmem_limit * 0.9)

    def vmem_estimate(TB, TH):
        est = 2 * TB * D_in_p * x_bytes            # x tile (double-buffered)
        est += 2 * 2 * D_in_p * TH * w_bytes       # W_enc + W_dec slabs (double-buffered)
        est += 2 * TB * TH * out_bytes             # encoded tile
        est += 2 * TB * D_in_p * out_bytes         # decoded tile
        if not out_is_f32:
            est += TB * D_in_p * 4                 # f32 decode accumulator scratch
        return est

    tb_eff = max(8, min(_round_up(tb, 8), B_p8))
    th_eff = max(128, min(_round_up(th, 128), D_hid_p128))
    while vmem_estimate(tb_eff, th_eff) > budget and th_eff > 128:
        th_eff = max(128, th_eff // 2)
    while vmem_estimate(tb_eff, th_eff) > budget and tb_eff > 8:
        tb_eff = max(8, tb_eff // 2)

    # Re-derive even tile sizes from the tile counts so the padding waste stays < one
    # sublane/lane group (not up to a whole tile).
    nb = _cdiv(B_p8, tb_eff)
    TB = _round_up(_cdiv(B_p8, nb), 8)
    B_p = nb * TB
    nh = _cdiv(D_hid_p128, th_eff)
    TH = _round_up(_cdiv(D_hid_p128, nh), 128)
    D_hid_p = nh * TH

    # ---- zero-pad (reduction-dim padding must be zeros for correctness) -----------
    # Padded hidden units: W_enc cols = 0 -> relu(0) = 0, W_dec rows = 0 -> contribute 0.
    # Padded D_in cols: x cols = 0 x W_enc rows = 0; decoded padded cols are sliced off.
    xp = jnp.pad(x, ((0, B_p - B), (0, D_in_p - D_in)))
    # TODO(synk): in a real deployment keep the weights stored in bf16 so this cast is free.
    w_enc_p = jnp.pad(w_enc.astype(jnp.bfloat16),
                      ((0, D_in_p - D_in), (0, D_hid_p - D_hid)))
    b_enc_p = jnp.pad(b_enc, ((0, 0), (0, D_hid_p - D_hid)))
    w_dec_p = jnp.pad(w_dec.astype(jnp.bfloat16),
                      ((0, D_hid_p - D_hid), (0, D_in_p - D_in)))
    b_dec_p = jnp.pad(b_dec, ((0, 0), (0, D_in_p - D_in)))

    scratch_shapes = [] if out_is_f32 else [pltpu.VMEM((TB, D_in_p), jnp.float32)]

    encoded_p, decoded_p = pl.pallas_call(
        sae_kernel,
        out_shape=(
            jax.ShapeDtypeStruct((B_p, D_hid_p), dtype),
            jax.ShapeDtypeStruct((B_p, D_in_p), dtype),
        ),
        grid_spec=pltpu.PrefetchScalarGridSpec(
            num_scalar_prefetch=0,
            grid=(nb, nh),
            in_specs=[
                pl.BlockSpec((TB, D_in_p), lambda b, h: (b, 0)),   # x batch tile
                pl.BlockSpec((D_in_p, TH), lambda b, h: (0, h)),   # W_enc hidden slab (bf16)
                pl.BlockSpec((1, TH),      lambda b, h: (0, h)),   # b_enc slice
                pl.BlockSpec((TH, D_in_p), lambda b, h: (h, 0)),   # W_dec hidden slab (bf16)
                pl.BlockSpec((1, D_in_p),  lambda b, h: (0, 0)),   # b_dec (init only)
            ],
            out_specs=(
                pl.BlockSpec((TB, TH),     lambda b, h: (b, h)),   # encoded tile
                pl.BlockSpec((TB, D_in_p), lambda b, h: (b, 0)),   # decoded (resident acc)
            ),
            scratch_shapes=scratch_shapes,
        ),
        compiler_params=pltpu.CompilerParams(
            # With small batch the batch axis has few tiles; megacore weight re-streaming
            # is then amortized poorly, but nb==1 degenerates to a single core anyway.
            dimension_semantics=("parallel", "arbitrary"),
            vmem_limit_bytes=vmem_limit,
        ),
    )(xp, w_enc_p, b_enc_p, w_dec_p, b_dec_p)

    # Strip padding.
    return encoded_p[:B, :D_hid], decoded_p[:B, :D_in]


def init_params(key, input_dim=64, hidden_dim=32, dtype=jnp.float32):
    """Deterministic init matching torch.nn.Linear's U(-1/sqrt(fan_in), 1/sqrt(fan_in))."""
    k1, k2, k3, k4 = jax.random.split(key, 4)
    bound_e = 1.0 / (input_dim ** 0.5)
    bound_d = 1.0 / (hidden_dim ** 0.5)
    w_enc = jax.random.uniform(k1, (input_dim, hidden_dim), dtype,
                               minval=-bound_e, maxval=bound_e)
    b_enc = jax.random.uniform(k2, (1, hidden_dim), dtype,
                               minval=-bound_e, maxval=bound_e)
    w_dec = jax.random.uniform(k3, (hidden_dim, input_dim), dtype,
                               minval=-bound_d, maxval=bound_d)
    b_dec = jax.random.uniform(k4, (1, input_dim), dtype,
                               minval=-bound_d, maxval=bound_d)
    return w_enc, b_enc, w_dec, b_dec


def _reference_f32(x, w_enc, b_enc, w_dec, b_dec):
    enc = jnp.maximum(x @ w_enc + b_enc, 0.0)
    dec = enc @ w_dec + b_dec
    return enc, dec


def _reference_bf16(x, w_enc, b_enc, w_dec, b_dec):
    """Emulates the kernel's mixed precision: bf16 MXU operands, f32 accum/epilogue."""
    f32 = jnp.float32
    bf = jnp.bfloat16
    xe = x.astype(bf).astype(f32)
    we = w_enc.astype(bf).astype(f32)
    enc = jnp.maximum(xe @ we + b_enc.astype(f32), 0.0)
    wd = w_dec.astype(bf).astype(f32)
    dec = enc.astype(bf).astype(f32) @ wd + b_dec.astype(f32)
    return enc.astype(x.dtype), dec.astype(x.dtype)


if __name__ == "__main__":
    # --- case 1: the module's default toy shapes (single-tile grid) -----------------
    input_dim, hidden_dim, batch = 64, 32, 8
    key = jax.random.PRNGKey(0)
    kx, kp, kx2, kp2 = jax.random.split(key, 4)

    x = jax.random.normal(kx, (batch, input_dim), jnp.float32)
    w_enc, b_enc, w_dec, b_dec = init_params(kp, input_dim, hidden_dim)

    encoded, decoded = simple_sae_forward(x, w_enc, b_enc, w_dec, b_dec)
    jax.block_until_ready((encoded, decoded))

    assert encoded.shape == (batch, hidden_dim) and decoded.shape == (batch, input_dim)
    enc_bf, dec_bf = _reference_bf16(x, w_enc, b_enc, w_dec, b_dec)
    assert jnp.allclose(encoded, enc_bf, atol=1e-4), "encoded mismatch vs bf16 ref (case 1)"
    assert jnp.allclose(decoded, dec_bf, atol=1e-4), "decoded mismatch vs bf16 ref (case 1)"
    # bf16 MXU operands drift slightly from the pure-f32 torch reference (documented).
    enc_f32, dec_f32 = _reference_f32(x, w_enc, b_enc, w_dec, b_dec)
    assert jnp.allclose(encoded, enc_f32, atol=2e-2), "encoded mismatch vs f32 ref (case 1)"
    assert jnp.allclose(decoded, dec_f32, atol=2e-2), "decoded mismatch vs f32 ref (case 1)"

    # --- case 2: ragged shapes with small tiles to exercise the multi-tile grid,
    #             minimal padding, and the hidden-axis accumulation path --------------
    input_dim2, hidden_dim2, batch2 = 100, 300, 24
    x2 = jax.random.normal(kx2, (batch2, input_dim2), jnp.float32)
    w_enc2, b_enc2, w_dec2, b_dec2 = init_params(kp2, input_dim2, hidden_dim2)

    encoded2, decoded2 = simple_sae_forward(x2, w_enc2, b_enc2, w_dec2, b_dec2,
                                            tb=8, th=128)
    jax.block_until_ready((encoded2, decoded2))

    enc_bf2, dec_bf2 = _reference_bf16(x2, w_enc2, b_enc2, w_dec2, b_dec2)
    assert jnp.allclose(encoded2, enc_bf2, atol=1e-4), "encoded mismatch vs bf16 ref (case 2)"
    assert jnp.allclose(decoded2, dec_bf2, atol=1e-4), "decoded mismatch vs bf16 ref (case 2)"
    enc_f322, dec_f322 = _reference_f32(x2, w_enc2, b_enc2, w_dec2, b_dec2)
    assert jnp.allclose(encoded2, enc_f322, atol=3e-2), "encoded mismatch vs f32 ref (case 2)"
    assert jnp.allclose(decoded2, dec_f322, atol=3e-2), "decoded mismatch vs f32 ref (case 2)"

    # TODO(synk): activation_cache / compute_loss are host-side bookkeeping, not kernel work.
    print("KERNEL_OK")
</pallas_src>

<mosaic_0001>
module attributes {stable_mosaic.version = 11 : i64} {
  func.func @sae_kernel(%arg0: i32, %arg1: i32, %arg2: memref<8x128xf32, #tpu.memory_space<vmem>>, %arg3: memref<128x128xbf16, #tpu.memory_space<vmem>>, %arg4: memref<1x128xf32, #tpu.memory_space<vmem>>, %arg5: memref<128x128xbf16, #tpu.memory_space<vmem>>, %arg6: memref<1x128xf32, #tpu.memory_space<vmem>>, %arg7: memref<8x128xf32, #tpu.memory_space<vmem>>, %arg8: memref<8x128xf32, #tpu.memory_space<vmem>>) attributes {dimension_semantics = [#tpu.dimension_semantics<parallel>, #tpu.dimension_semantics<arbitrary>], iteration_bounds = array<i64: 1, 1>, scalar_prefetch = 0 : i64, scratch_operands = 0 : i64, tpu.core_type = #tpu.core_type<tc>, window_params = [{transform_indices = @transform_0, window_bounds = array<i64: 8, 128>}, {transform_indices = @transform_1, window_bounds = array<i64: 128, 128>}, {transform_indices = @transform_2, window_bounds = array<i64: 1, 128>}, {transform_indices = @transform_3, window_bounds = array<i64: 128, 128>}, {pipeline_mode = #tpu.pipeline_mode<synchronous>, transform_indices = @transform_4, window_bounds = array<i64: 1, 128>}, {transform_indices = @transform_5, window_bounds = array<i64: 8, 128>}, {transform_indices = @transform_6, window_bounds = array<i64: 8, 128>}]} {
    %c0_i32 = arith.constant 0 : i32
    %0 = arith.cmpi eq, %arg1, %c0_i32 : i32
    %1 = arith.extui %0 : i1 to i32
    %c0_i32_0 = arith.constant 0 : i32
    %2 = arith.cmpi ne, %1, %c0_i32_0 : i32
    scf.if %2 {
      %c0_16 = arith.constant 0 : index
      %c0_17 = arith.constant 0 : index
      %19 = vector.load %arg6[%c0_16, %c0_17] : memref<1x128xf32, #tpu.memory_space<vmem>>, vector<1x128xf32>
      %20 = vector.shape_cast %19 : vector<1x128xf32> to vector<1x128xf32>
      %21 = vector.broadcast %20 : vector<1x128xf32> to vector<8x128xf32>
      %c0_18 = arith.constant 0 : index
      %c0_19 = arith.constant 0 : index
      %22 = vector.load %arg8[%c0_18, %c0_19] : memref<8x128xf32, #tpu.memory_space<vmem>>, vector<8x128xf32>
      tpu.vector_store %arg8[%c0_18, %c0_19], %21 {strides = array<i32>} : memref<8x128xf32, #tpu.memory_space<vmem>>, vector<8x128xf32>,
    } else {
    }
    %c0 = arith.constant 0 : index
    %c0_1 = arith.constant 0 : index
    %3 = vector.load %arg2[%c0, %c0_1] : memref<8x128xf32, #tpu.memory_space<vmem>>, vector<8x128xf32>
    %4 = arith.truncf %3 : vector<8x128xf32> to vector<8x128xbf16>
    %c0_2 = arith.constant 0 : index
    %c0_3 = arith.constant 0 : index
    %5 = vector.load %arg3[%c0_2, %c0_3] : memref<128x128xbf16, #tpu.memory_space<vmem>>, vector<128x128xbf16>
    %cst = arith.constant dense<0.000000e+00> : vector<8x128xf32>
    %6 = tpu.matmul %4, %5, %cst {dimension_numbers = #tpu.dot_dimension_numbers<[1], [0], [0], [1], [0, 0, 1, 1], [], []>} : vector<8x128xbf16>, vector<128x128xbf16>, vector<8x128xf32> -> vector<8x128xf32>
    %c0_4 = arith.constant 0 : index
    %c0_5 = arith.constant 0 : index
    %7 = vector.load %arg4[%c0_4, %c0_5] : memref<1x128xf32, #tpu.memory_space<vmem>>, vector<1x128xf32>
    %8 = vector.broadcast %7 : vector<1x128xf32> to vector<8x128xf32>
    %9 = arith.addf %6, %8 : vector<8x128xf32>
    %cst_6 = arith.constant 0.000000e+00 : f32
    %10 = vector.broadcast %cst_6 : f32 to vector<8x128xf32>
    %11 = arith.maximumf %9, %10 : vector<8x128xf32>
    %c0_7 = arith.constant 0 : index
    %c0_8 = arith.constant 0 : index
    %12 = vector.load %arg7[%c0_7, %c0_8] : memref<8x128xf32, #tpu.memory_space<vmem>>, vector<8x128xf32>
    tpu.vector_store %arg7[%c0_7, %c0_8], %11 {strides = array<i32>} : memref<8x128xf32, #tpu.memory_space<vmem>>, vector<8x128xf32>,
    %c0_9 = arith.constant 0 : index
    %c0_10 = arith.constant 0 : index
    %13 = vector.load %arg8[%c0_9, %c0_10] : memref<8x128xf32, #tpu.memory_space<vmem>>, vector<8x128xf32>
    %14 = arith.truncf %11 : vector<8x128xf32> to vector<8x128xbf16>
    %c0_11 = arith.constant 0 : index
    %c0_12 = arith.constant 0 : index
    %15 = vector.load %arg5[%c0_11, %c0_12] : memref<128x128xbf16, #tpu.memory_space<vmem>>, vector<128x128xbf16>
    %cst_13 = arith.constant dense<0.000000e+00> : vector<8x128xf32>
    %16 = tpu.matmul %14, %15, %cst_13 {dimension_numbers = #tpu.dot_dimension_numbers<[1], [0], [0], [1], [0, 0, 1, 1], [], []>} : vector<8x128xbf16>, vector<128x128xbf16>, vector<8x128xf32> -> vector<8x128xf32>
    %17 = arith.addf %13, %16 : vector<8x128xf32>
    %c0_14 = arith.constant 0 : index
    %c0_15 = arith.constant 0 : index
    %18 = vector.load %arg8[%c0_14, %c0_15] : memref<8x128xf32, #tpu.memory_space<vmem>>, vector<8x128xf32>
    tpu.vector_store %arg8[%c0_14, %c0_15], %17 {strides = array<i32>} : memref<8x128xf32, #tpu.memory_space<vmem>>, vector<8x128xf32>,
    return
  }
  func.func @transform_0(%arg0: i32, %arg1: i32) -> (i32, i32) {
    %c0_i32 = arith.constant 0 : i32
    %c0_i32_0 = arith.constant 0 : i32
    return %arg0, %c0_i32 : i32, i32
  }
  func.func @transform_1(%arg0: i32, %arg1: i32) -> (i32, i32) {
    %c0_i32 = arith.constant 0 : i32
    %c0_i32_0 = arith.constant 0 : i32
    return %c0_i32, %arg1 : i32, i32
  }
  func.func @transform_2(%arg0: i32, %arg1: i32) -> (i32, i32) {
    %c0_i32 = arith.constant 0 : i32
    %c0_i32_0 = arith.constant 0 : i32
    return %c0_i32, %arg1 : i32, i32
  }
  func.func @transform_3(%arg0: i32, %arg1: i32) -> (i32, i32) {
    %c0_i32 = arith.constant 0 : i32
    %c0_i32_0 = arith.constant 0 : i32
    return %arg1, %c0_i32 : i32, i32
  }
  func.func @transform_4(%arg0: i32, %arg1: i32) -> (i32, i32) {
    %c0_i32 = arith.constant 0 : i32
    %c0_i32_0 = arith.constant 0 : i32
    %c0_i32_1 = arith.constant 0 : i32
    return %c0_i32, %c0_i32_0 : i32, i32
  }
  func.func @transform_5(%arg0: i32, %arg1: i32) -> (i32, i32) {
    %c0_i32 = arith.constant 0 : i32
    return %arg0, %arg1 : i32, i32
  }
  func.func @transform_6(%arg0: i32, %arg1: i32) -> (i32, i32) {
    %c0_i32 = arith.constant 0 : i32
    %c0_i32_0 = arith.constant 0 : i32
    return %arg0, %c0_i32 : i32, i32
  }
}

</mosaic_0001>

<bundles_post_ra>
// kernel: simple_sae_forward.1
= control target key start
LH: loop header
LB: loop body
LE: loop exit
PB: predicated region body
PF: predicated region fallthrough
CT: control target
= control target key end

     0   :  { %12 = vsyncpa [#allocation3], 0  ;;  %s467_s0 = inlined_call_operand.vmem [shape: f32[8,128], index: 0, kind: input, shape index: {}]   ;;  %s468_s1 = inlined_call_operand.vmem [shape: bf16[128,128], index: 1, kind: input, shape index: {}]   ;;  %s469_s2 = inlined_call_operand.vmem [shape: f32[1,128], index: 2, kind: input, shape index: {}]   ;;  %s470_s3 = inlined_call_operand.vmem [shape: bf16[128,128], index: 3, kind: input, shape index: {}]   ;;  %s471_s4 = inlined_call_operand.vmem [shape: f32[1,128], index: 4, kind: input, shape index: {}]   ;;  %s472_s5 = inlined_call_operand.hbm [shape: f32[8,128], index: 5, kind: output, shape index: {0}]   ;;  %s473_s6 = inlined_call_operand.hbm [shape: f32[8,128], index: 6, kind: output, shape index: {1}]  }
   0x1   :  { %v302_v0 = vld [vmem:[%s468_s1 + $0x38] sm:$0xff]  ;;  %v301_v1 = vld [vmem:[%s468_s1 + $0x30] sm:$0xff]  ;;  %v300_v4 = vld [vmem:[%s468_s1 + $0x28] sm:$0xff] }
   0x2   :  { %103 = vmatpush.bf16.msra.mxu0 %v302_v0  ;;  %v310_v2 = vld [vmem:[%s470_s3 + $0x38] sm:$0xff]  ;;  %v309_v3 = vld [vmem:[%s470_s3 + $0x30] sm:$0xff] }
   0x3   :  { %184 = vmatpush.bf16.msra.mxu1 %v310_v2 }
   0x6   :  { %104 = vmatpush.bf16.msra.mxu0 %v301_v1 }
   0x7   :  { %13 = vsyncpa [#allocation5], 0  ;;  %185 = vmatpush.bf16.msra.mxu1 %v309_v3  ;;  %v308_v5 = vld [vmem:[%s470_s3 + $0x28] sm:$0xff]  ;;  %v299_v6 = vld [vmem:[%s468_s1 + $0x20] sm:$0xff]  ;;  %s206_s11 = sshll.u32 %s472_s5, 4  ;;  %s217_s16 = sshll.u32 %s473_s6, 4  ;;  %s207_s11 = int_to_ptr.hbm [resolvable:$true] %s206_s11  ;;  %s218_s16 = int_to_ptr.hbm [resolvable:$true] %s217_s16 }
   0x8   :  { %v307_v7 = vld [vmem:[%s470_s3 + $0x20] sm:$0xff]  ;;  %v298_v8 = vld [vmem:[%s468_s1 + $0x18] sm:$0xff]  ;;  %v297_v10 = vld [vmem:[%s468_s1 + $0x10] sm:$0xff] }
   0x9   :  { %v306_v9 = vld [vmem:[%s470_s3 + $0x18] sm:$0xff]  ;;  %v305_v11 = vld [vmem:[%s470_s3 + $0x10] sm:$0xff]  ;;  %v296_v12 = vld [vmem:[%s468_s1 + $0x8] sm:$0xff] }
   0xa   :  { %105 = vmatpush.bf16.msra.mxu0 %v300_v4  ;;  %v295_v13 = vld [vmem:[%s468_s1] sm:$0xff]  ;;  %v304_v16 = vld [vmem:[%s470_s3 + $0x8] sm:$0xff] }
   0xb   :  { %186 = vmatpush.bf16.msra.mxu1 %v308_v5  ;;  %v33_v14 = vld [vmem:[%s467_s0] sm:$0xff]  ;;  %s367_s0 = smov [#allocation2]  }
   0xc   :  { %v34_v15 = vpack.c.bf16 %v33_v14, %v33_v14  ;;  %v303_v17 = vld [vmem:[%s470_s3] sm:$0xff]  ;;  %s204_s1 = sshll.u32 %s367_s0, 4  ;;  %s205_s1 = int_to_ptr.vmem [resolvable:$true] %s204_s1 }
   0xd   :  { %v313_v18 = vld [vmem:[%s469_s2] ss:$0 sm:$0xff]  ;;  %s368_s2 = smov [#allocation4]  }
   0xe   :  { %106 = vmatpush.bf16.msra.mxu0 %v299_v6  ;;  %v314_v24 = vld [vmem:[%s471_s4] ss:$0 sm:$0xff]  ;;  %s215_s13 = sshll.u32 %s368_s2, 4  ;;  %s216_s13 = int_to_ptr.vmem [resolvable:$true] %s215_s13 }
   0xf   :  { %187 = vmatpush.bf16.msra.mxu1 %v307_v7 }
  0x12   :  { %107 = vmatpush.bf16.msra.mxu0 %v298_v8 }
  0x13   :  { %188 = vmatpush.bf16.msra.mxu1 %v306_v9 }
  0x16   :  { %108 = vmatpush.bf16.msra.mxu0 %v297_v10 }
  0x17   :  { %189 = vmatpush.bf16.msra.mxu1 %v305_v11 }
  0x1a   :  { %109 = vmatpush.bf16.msra.mxu0 %v296_v12 }
  0x1b   :  { %190 = vmatpush.bf16.msra.mxu1 %v304_v16 }
  0x1e   :  { %110 = vmatpush.bf16.msra.mxu0 %v295_v13 }
  0x1f   :  { %191 = vmatpush.bf16.msra.mxu1 %v303_v17 }
  0x21   :  { %111 = vmatmul.bf16.vlgmr.msra.gmra.mxu0 %v34_v15 }
  0x9e   :  { %v112_v19 = vpop.f32.mrf.mxu0 }
  0x9f   :  { %v113_v20 = vadd.f32 %v313_v18, %v112_v19 }
  0xa1   :  { %v116_v21 = vmax.f32 %v113_v20, 0.0 }
  0xa3   :  { %117 = vst [vmem:[#allocation2] sm:$0xff] %v116_v21  ;;  %v119_v22 = vpack.c.bf16 %v116_v21, %v116_v21 }
  0xa4   :  { %209 = dma.vmem_to_hbm [thread:$0]  %s205_s1, 128, %s207_s11, [#allocation3]  }
  0xa5   :  { %192 = vmatmul.bf16.vlgmr.msra.gmra.mxu1 %v119_v22 }
  0xa6   :  { %v114_v23 = vpop.f32.mrf.mxu0 }
 0x122   :  { %v193_v25 = vpop.f32.mrf.mxu1 }
 0x123   :  { %v197_v26 = vadd.f32 %v314_v24, %v193_v25 }
 0x125   :  { %198 = vst [vmem:[#allocation4] sm:$0xff] %v197_v26 }
 0x126   :  { %220 = dma.vmem_to_hbm [thread:$0]  %s216_s13, 128, %s218_s16, [#allocation5]  }
 0x12a   :  { %v195_v27 = vpop.f32.mrf.mxu1 }
 0x12b   :  { %363 = dma.done.wait [#allocation3], 128  }
 0x12c   :  { %364 = vsyncadd [#allocation3], 4294967168 }
 0x12d   :  { %365 = dma.done.wait [#allocation5], 128  }
 0x12e   :  { %366 = vsyncadd [#allocation5], 4294967168 }
 0x12f   :  { %229 = vsyncpa [#allocation3], 1 }
 0x130   :  { %230 = vsyncpa [#allocation5], 1 }

</bundles_post_ra>
